<compile_context>
chip_gen: v7x
topology: tpu7x:2x2x1
jax: 0.10.0
libtpu: 0.0.40
codegen_flags: <defaults>
</compile_context>

<pallas_src>
import math

import jax
import jax.numpy as jnp
from jax import lax
from jax.experimental import pallas as pl
from jax.experimental.pallas import tpu as pltpu


def _lstm_seq_kernel(x_ref, h0_ref, c0_ref,
                     w_h_ref, w_x_ref, b_z_ref, w_y_ref, b_y_ref,
                     h_seq_ref, y_seq_ref, h_out_ref, c_out_ref,
                     xw_scr):
    """Full LSTM recurrence for one sequence in a single kernel invocation.

    x_ref:     (T*B, D)   time-major flattened inputs (row = t*B + b)
    h0/c0:     (B, H)     initial state
    w_h_ref:   (H, 4H)    fused gate weights, h part of z        [i|f|o|c]
    w_x_ref:   (D, 4H)    fused gate weights, x part of z
    b_z_ref:   (1, 4H)    fused gate biases
    w_y_ref:   (O, H)     output projection (PyTorch layout)
    b_y_ref:   (1, O)
    h_seq_ref: (T*B, H)   all hidden states (dense slab)
    y_seq_ref: (T*B, O)   all outputs
    """
    TB = x_ref.shape[0]
    B, H = h0_ref.shape
    T = TB // B
    O = w_y_ref.shape[0]

    # Gate weights stay VMEM-resident (loaded once) for the whole sequence.
    w_h = w_h_ref[...]                                     # (H, 4H)

    # --- Hoisted input contribution: one M-dense matmul + bias, off the
    # serial recurrence path.  Bias folded in here so the per-step chain is
    # just {MXU dot, VPU add, EUP x3, VPU muls}.
    xw_scr[...] = jnp.dot(x_ref[...], w_x_ref[...],
                          preferred_element_type=jnp.float32) + b_z_ref[...]

    def step(t, carry):
        h_t, c_t = carry                                   # vreg-resident
        row = pl.multiple_of(t * B, B)
        xw_t = xw_scr[pl.ds(row, B), :]                    # (B, 4H), lane-dense

        gates = jnp.dot(h_t, w_h, preferred_element_type=jnp.float32) + xw_t

        # 3 EUP transcendentals per step (was 5): one sigmoid over the full
        # gates tile, one tanh for the candidate lanes, one tanh(c_new).
        sg = jax.nn.sigmoid(gates)                         # (B, 4H)
        i_t = sg[:, 0 * H:1 * H]
        f_t = sg[:, 1 * H:2 * H]
        o_t = sg[:, 2 * H:3 * H]
        c_tilde = jnp.tanh(gates[:, 3 * H:4 * H])

        c_new = f_t * c_t + i_t * c_tilde
        h_new = o_t * jnp.tanh(c_new)

        h_seq_ref[pl.ds(row, B), :] = h_new                # dense (T*B, H) slab
        return (h_new, c_new)

    h_T, c_T = lax.fori_loop(0, T, step, (h0_ref[...], c0_ref[...]),
                             unroll=(T if T <= 8 else 8))
    h_out_ref[...] = h_T
    c_out_ref[...] = c_T

    # --- Output projection hoisted out of the recurrence (y does not feed the
    # state).  h_seq_ref is already (T*B, H): zero relayout on the read-back.
    h_all = h_seq_ref[...]                                 # (T*B, H)
    w_y = w_y_ref[...]                                     # (O, H)
    if O == 1:
        # O = 1: keep it off the MXU -- VPU multiply + cross-lane reduction.
        y_all = jnp.sum(h_all * w_y, axis=-1, keepdims=True) + b_y_ref[...]
    else:
        y_all = lax.dot_general(h_all, w_y, (((1,), (1,)), ((), ())),
                                preferred_element_type=jnp.float32) + b_y_ref[...]
    y_seq_ref[...] = y_all


def prepare_params(params):
    """One-time layout plumbing: fuse + transpose PyTorch-layout parameters."""
    H = params["W_i"].shape[0]
    # PyTorch layout: W_* is (H, Z) with Z = H + D (h first in z).  Fuse along
    # the output axis and transpose so the kernel contracts on RHS dim 0.
    w_z = jnp.concatenate(
        [params["W_i"], params["W_f"], params["W_o"], params["W_c"]],
        axis=0).T                                          # (Z, 4H)
    b_z = jnp.concatenate(
        [params["b_i"], params["b_f"], params["b_o"], params["b_c"]]
    ).reshape(1, -1)                                       # (1, 4H)
    return {
        "W_h": w_z[:H, :],                                 # (H, 4H)
        "W_x": w_z[H:, :],                                 # (D, 4H)
        "b_z": b_z,
        "W_y": params["W_y"],                              # (O, H) (as-is)
        "b_y": params["b_y"].reshape(1, -1),               # (1, O)
    }


def lstm_forward_sequence(x_seq, h0, c0, fused):
    """Run SimpleLSTM.forward over a whole sequence in ONE pallas_call.

    x_seq: (B, T, D).  Returns (h_seq (B,T,H), y_seq (B,T,O), h_T, c_T).
    """
    B, T, D = x_seq.shape
    H = h0.shape[1]
    O = fused["W_y"].shape[0]

    # Time-major, flattened to a dense (T*B, D) slab (row = t*B + b).
    x_flat = jnp.transpose(x_seq, (1, 0, 2)).reshape(T * B, D)

    vmem = pl.BlockSpec(memory_space=pltpu.MemorySpace.VMEM)
    h_flat, y_flat, h_T, c_T = pl.pallas_call(
        _lstm_seq_kernel,
        out_shape=(
            jax.ShapeDtypeStruct((T * B, H), jnp.float32),
            jax.ShapeDtypeStruct((T * B, O), jnp.float32),
            jax.ShapeDtypeStruct((B, H), jnp.float32),
            jax.ShapeDtypeStruct((B, H), jnp.float32),
        ),
        in_specs=[vmem] * 8,
        out_specs=(vmem, vmem, vmem, vmem),
        scratch_shapes=[pltpu.VMEM((T * B, 4 * H), jnp.float32)],  # x @ W_x + b
    )(x_flat, h0, c0,
      fused["W_h"], fused["W_x"], fused["b_z"], fused["W_y"], fused["b_y"])

    h_seq = jnp.transpose(h_flat.reshape(T, B, H), (1, 0, 2))
    y_seq = jnp.transpose(y_flat.reshape(T, B, O), (1, 0, 2))
    return h_seq, y_seq, h_T, c_T


def lstm_forward_step(x_t, h_t, c_t, fused):
    """Exact equivalent of SimpleLSTM.forward (one timestep) -> (h, c, y)."""
    _, y_seq, h_new, c_new = lstm_forward_sequence(x_t[:, None, :], h_t, c_t, fused)
    return h_new, c_new, y_seq[:, 0, :]


# ------------------------- init + pure-JAX reference -------------------------

def _xavier_uniform(key, shape):
    fan_out, fan_in = shape
    limit = math.sqrt(6.0 / (fan_in + fan_out))
    return jax.random.uniform(key, shape, jnp.float32, -limit, limit)


def init_params(key, input_dim_plus1, hidden_dim, output_dim):
    """Shapes mirror SimpleLSTM.__init__ (PyTorch layout).

    Note: the module's init_weights() zero-inits 1-D params; small nonzero
    biases are used here only so the fused-bias path is actually exercised.
    """
    Z = input_dim_plus1 + hidden_dim
    keys = jax.random.split(key, 10)
    return {
        "W_i": _xavier_uniform(keys[0], (hidden_dim, Z)),
        "W_f": _xavier_uniform(keys[1], (hidden_dim, Z)),
        "W_o": _xavier_uniform(keys[2], (hidden_dim, Z)),
        "W_c": _xavier_uniform(keys[3], (hidden_dim, Z)),
        "W_y": _xavier_uniform(keys[4], (output_dim, hidden_dim)),
        "b_i": 0.1 * jax.random.normal(keys[5], (hidden_dim,), jnp.float32),
        "b_f": 0.1 * jax.random.normal(keys[6], (hidden_dim,), jnp.float32),
        "b_o": 0.1 * jax.random.normal(keys[7], (hidden_dim,), jnp.float32),
        "b_c": 0.1 * jax.random.normal(keys[8], (hidden_dim,), jnp.float32),
        "b_y": 0.1 * jax.random.normal(keys[9], (output_dim,), jnp.float32),
    }


def _reference_step(x_t, h_t, c_t, p):
    """Pure-JAX mirror of the PyTorch forward (one timestep)."""
    z = jnp.concatenate([h_t, x_t], axis=1)
    i = jax.nn.sigmoid(z @ p["W_i"].T + p["b_i"])
    f = jax.nn.sigmoid(z @ p["W_f"].T + p["b_f"])
    o = jax.nn.sigmoid(z @ p["W_o"].T + p["b_o"])
    ct = jnp.tanh(z @ p["W_c"].T + p["b_c"])
    c = f * c_t + i * ct
    h = o * jnp.tanh(c)
    y = h @ p["W_y"].T + p["b_y"]
    return h, c, y


def _reference_sequence(x_seq, h0, c0, p):
    h, c = h0, c0
    hs, ys = [], []
    for t in range(x_seq.shape[1]):
        h, c, y = _reference_step(x_seq[:, t, :], h, c, p)
        hs.append(h)
        ys.append(y)
    return jnp.stack(hs, axis=1), jnp.stack(ys, axis=1), h, c


if __name__ == "__main__":
    # raw input_dim = 4 -> module input_dim = 5 (input_dim + 1 shifted-y chan),
    # hidden_dim = 32 (so 4H = 128, one lane width), output_dim = 1,
    # batch = 2, seq = 8.
    B, D_RAW, H, O, T = 2, 4, 32, 1, 8
    D = D_RAW + 1

    key = jax.random.PRNGKey(0)
    k_param, k_x, k_h, k_c = jax.random.split(key, 4)

    params = init_params(k_param, D, H, O)
    fused = prepare_params(params)

    x_seq = jax.random.normal(k_x, (B, T, D), jnp.float32)
    h0 = jax.random.uniform(k_h, (B, H), jnp.float32)
    c0 = jax.random.uniform(k_c, (B, H), jnp.float32)

    # Fused whole-sequence kernel (the fast path, mirrors train()/test() loop).
    h_seq, y_seq, h_T, c_T = lstm_forward_sequence(x_seq, h0, c0, fused)
    jax.block_until_ready((h_seq, y_seq, h_T, c_T))

    h_ref_seq, y_ref_seq, h_ref_T, c_ref_T = _reference_sequence(x_seq, h0, c0, params)
    assert h_seq.shape == (B, T, H) and y_seq.shape == (B, T, O)
    assert h_T.shape == (B, H) and c_T.shape == (B, H)
    assert jnp.allclose(h_seq, h_ref_seq, atol=1e-4, rtol=1e-4)
    assert jnp.allclose(y_seq, y_ref_seq, atol=1e-4, rtol=1e-4)
    assert jnp.allclose(h_T, h_ref_T, atol=1e-4, rtol=1e-4)
    assert jnp.allclose(c_T, c_ref_T, atol=1e-4, rtol=1e-4)

    # Single-timestep path (exact SimpleLSTM.forward signature/semantics).
    h1, c1, y1 = lstm_forward_step(x_seq[:, 0, :], h0, c0, fused)
    jax.block_until_ready((h1, c1, y1))
    h1_ref, c1_ref, y1_ref = _reference_step(x_seq[:, 0, :], h0, c0, params)
    assert jnp.allclose(h1, h1_ref, atol=1e-5)
    assert jnp.allclose(c1, c1_ref, atol=1e-5)
    assert jnp.allclose(y1, y1_ref, atol=1e-5)

    print("KERNEL_OK")
</pallas_src>

<mosaic_0001>
module attributes {stable_mosaic.version = 11 : i64} {
  func.func @_lstm_seq_kernel(%arg0: memref<16x5xf32, #tpu.memory_space<vmem>>, %arg1: memref<2x32xf32, #tpu.memory_space<vmem>>, %arg2: memref<2x32xf32, #tpu.memory_space<vmem>>, %arg3: memref<32x128xf32, #tpu.memory_space<vmem>>, %arg4: memref<5x128xf32, #tpu.memory_space<vmem>>, %arg5: memref<1x128xf32, #tpu.memory_space<vmem>>, %arg6: memref<1x32xf32, #tpu.memory_space<vmem>>, %arg7: memref<1x1xf32, #tpu.memory_space<vmem>>, %arg8: memref<16x32xf32, #tpu.memory_space<vmem>>, %arg9: memref<16x1xf32, #tpu.memory_space<vmem>>, %arg10: memref<2x32xf32, #tpu.memory_space<vmem>>, %arg11: memref<2x32xf32, #tpu.memory_space<vmem>>, %arg12: memref<16x128xf32, #tpu.memory_space<vmem>>) attributes {dimension_semantics = [], scalar_prefetch = 0 : i64, scratch_operands = 1 : i64, tpu.core_type = #tpu.core_type<tc>} {
    %c0 = arith.constant 0 : index
    %c0_0 = arith.constant 0 : index
    %0 = vector.load %arg3[%c0, %c0_0] : memref<32x128xf32, #tpu.memory_space<vmem>>, vector<32x128xf32>
    %c0_1 = arith.constant 0 : index
    %c0_2 = arith.constant 0 : index
    %1 = vector.load %arg0[%c0_1, %c0_2] : memref<16x5xf32, #tpu.memory_space<vmem>>, vector<16x5xf32>
    %c0_3 = arith.constant 0 : index
    %c0_4 = arith.constant 0 : index
    %2 = vector.load %arg4[%c0_3, %c0_4] : memref<5x128xf32, #tpu.memory_space<vmem>>, vector<5x128xf32>
    %cst = arith.constant dense<0.000000e+00> : vector<16x128xf32>
    %3 = tpu.matmul %1, %2, %cst {dimension_numbers = #tpu.dot_dimension_numbers<[1], [0], [0], [1], [0, 0, 1, 1], [], []>} : vector<16x5xf32>, vector<5x128xf32>, vector<16x128xf32> -> vector<16x128xf32>
    %c0_5 = arith.constant 0 : index
    %c0_6 = arith.constant 0 : index
    %4 = vector.load %arg5[%c0_5, %c0_6] : memref<1x128xf32, #tpu.memory_space<vmem>>, vector<1x128xf32>
    %5 = vector.broadcast %4 : vector<1x128xf32> to vector<16x128xf32>
    %6 = arith.addf %3, %5 : vector<16x128xf32>
    %c0_7 = arith.constant 0 : index
    %c0_8 = arith.constant 0 : index
    %7 = vector.load %arg12[%c0_7, %c0_8] : memref<16x128xf32, #tpu.memory_space<vmem>>, vector<16x128xf32>
    tpu.vector_store %arg12[%c0_7, %c0_8], %6 {strides = array<i32>} : memref<16x128xf32, #tpu.memory_space<vmem>>, vector<16x128xf32>,
    %c0_9 = arith.constant 0 : index
    %c0_10 = arith.constant 0 : index
    %8 = vector.load %arg1[%c0_9, %c0_10] : memref<2x32xf32, #tpu.memory_space<vmem>>, vector<2x32xf32>
    %c0_11 = arith.constant 0 : index
    %c0_12 = arith.constant 0 : index
    %9 = vector.load %arg2[%c0_11, %c0_12] : memref<2x32xf32, #tpu.memory_space<vmem>>, vector<2x32xf32>
    %c0_i32 = arith.constant 0 : i32
    %c2_i32 = arith.constant 2 : i32
    %10 = arith.muli %c0_i32, %c2_i32 : i32
    %11 = tpu.assume_multiple %10, 2 : i32
    %12 = arith.index_cast %11 : i32 to index
    %c0_13 = arith.constant 0 : index
    %13 = vector.load %arg12[%12, %c0_13] : memref<16x128xf32, #tpu.memory_space<vmem>>, vector<2x128xf32>
    %cst_14 = arith.constant dense<0.000000e+00> : vector<2x128xf32>
    %14 = tpu.matmul %8, %0, %cst_14 {dimension_numbers = #tpu.dot_dimension_numbers<[1], [0], [0], [1], [0, 0, 1, 1], [], []>} : vector<2x32xf32>, vector<32x128xf32>, vector<2x128xf32> -> vector<2x128xf32>
    %15 = arith.addf %14, %13 : vector<2x128xf32>
    %16 = arith.negf %15 : vector<2x128xf32>
    %17 = math.exp %16 : vector<2x128xf32>
    %cst_15 = arith.constant 1.000000e+00 : f32
    %18 = vector.broadcast %cst_15 : f32 to vector<2x128xf32>
    %19 = arith.addf %18, %17 : vector<2x128xf32>
    %20 = arith.divf %18, %19 : vector<2x128xf32>
    %21 = vector.extract_strided_slice %20 {offsets = [0, 0], sizes = [2, 32], strides = [1, 1]} : vector<2x128xf32> to vector<2x32xf32>
    %22 = vector.extract_strided_slice %20 {offsets = [0, 32], sizes = [2, 32], strides = [1, 1]} : vector<2x128xf32> to vector<2x32xf32>
    %23 = vector.extract_strided_slice %20 {offsets = [0, 64], sizes = [2, 32], strides = [1, 1]} : vector<2x128xf32> to vector<2x32xf32>
    %24 = vector.extract_strided_slice %15 {offsets = [0, 96], sizes = [2, 32], strides = [1, 1]} : vector<2x128xf32> to vector<2x32xf32>
    %25 = math.tanh %24 : vector<2x32xf32>
    %26 = arith.mulf %22, %9 : vector<2x32xf32>
    %27 = arith.mulf %21, %25 : vector<2x32xf32>
    %28 = arith.addf %26, %27 : vector<2x32xf32>
    %29 = math.tanh %28 : vector<2x32xf32>
    %30 = arith.mulf %23, %29 : vector<2x32xf32>
    %31 = arith.index_cast %11 : i32 to index
    %c0_16 = arith.constant 0 : index
    %32 = vector.load %arg8[%31, %c0_16] : memref<16x32xf32, #tpu.memory_space<vmem>>, vector<2x32xf32>
    tpu.vector_store %arg8[%31, %c0_16], %30 {strides = array<i32>} : memref<16x32xf32, #tpu.memory_space<vmem>>, vector<2x32xf32>,
    %c1_i32 = arith.constant 1 : i32
    %c2_i32_17 = arith.constant 2 : i32
    %33 = arith.muli %c1_i32, %c2_i32_17 : i32
    %34 = tpu.assume_multiple %33, 2 : i32
    %35 = arith.index_cast %34 : i32 to index
    %c0_18 = arith.constant 0 : index
    %36 = vector.load %arg12[%35, %c0_18] : memref<16x128xf32, #tpu.memory_space<vmem>>, vector<2x128xf32>
    %cst_19 = arith.constant dense<0.000000e+00> : vector<2x128xf32>
    %37 = tpu.matmul %30, %0, %cst_19 {dimension_numbers = #tpu.dot_dimension_numbers<[1], [0], [0], [1], [0, 0, 1, 1], [], []>} : vector<2x32xf32>, vector<32x128xf32>, vector<2x128xf32> -> vector<2x128xf32>
    %38 = arith.addf %37, %36 : vector<2x128xf32>
    %39 = arith.negf %38 : vector<2x128xf32>
    %40 = math.exp %39 : vector<2x128xf32>
    %cst_20 = arith.constant 1.000000e+00 : f32
    %41 = vector.broadcast %cst_20 : f32 to vector<2x128xf32>
    %42 = arith.addf %41, %40 : vector<2x128xf32>
    %43 = arith.divf %41, %42 : vector<2x128xf32>
    %44 = vector.extract_strided_slice %43 {offsets = [0, 0], sizes = [2, 32], strides = [1, 1]} : vector<2x128xf32> to vector<2x32xf32>
    %45 = vector.extract_strided_slice %43 {offsets = [0, 32], sizes = [2, 32], strides = [1, 1]} : vector<2x128xf32> to vector<2x32xf32>
    %46 = vector.extract_strided_slice %43 {offsets = [0, 64], sizes = [2, 32], strides = [1, 1]} : vector<2x128xf32> to vector<2x32xf32>
    %47 = vector.extract_strided_slice %38 {offsets = [0, 96], sizes = [2, 32], strides = [1, 1]} : vector<2x128xf32> to vector<2x32xf32>
    %48 = math.tanh %47 : vector<2x32xf32>
    %49 = arith.mulf %45, %28 : vector<2x32xf32>
    %50 = arith.mulf %44, %48 : vector<2x32xf32>
    %51 = arith.addf %49, %50 : vector<2x32xf32>
    %52 = math.tanh %51 : vector<2x32xf32>
    %53 = arith.mulf %46, %52 : vector<2x32xf32>
    %54 = arith.index_cast %34 : i32 to index
    %c0_21 = arith.constant 0 : index
    %55 = vector.load %arg8[%54, %c0_21] : memref<16x32xf32, #tpu.memory_space<vmem>>, vector<2x32xf32>
    tpu.vector_store %arg8[%54, %c0_21], %53 {strides = array<i32>} : memref<16x32xf32, #tpu.memory_space<vmem>>, vector<2x32xf32>,
    %c2_i32_22 = arith.constant 2 : i32
    %c2_i32_23 = arith.constant 2 : i32
    %56 = arith.muli %c2_i32_22, %c2_i32_23 : i32
    %57 = tpu.assume_multiple %56, 2 : i32
    %58 = arith.index_cast %57 : i32 to index
    %c0_24 = arith.constant 0 : index
    %59 = vector.load %arg12[%58, %c0_24] : memref<16x128xf32, #tpu.memory_space<vmem>>, vector<2x128xf32>
    %cst_25 = arith.constant dense<0.000000e+00> : vector<2x128xf32>
    %60 = tpu.matmul %53, %0, %cst_25 {dimension_numbers = #tpu.dot_dimension_numbers<[1], [0], [0], [1], [0, 0, 1, 1], [], []>} : vector<2x32xf32>, vector<32x128xf32>, vector<2x128xf32> -> vector<2x128xf32>
    %61 = arith.addf %60, %59 : vector<2x128xf32>
    %62 = arith.negf %61 : vector<2x128xf32>
    %63 = math.exp %62 : vector<2x128xf32>
    %cst_26 = arith.constant 1.000000e+00 : f32
    %64 = vector.broadcast %cst_26 : f32 to vector<2x128xf32>
    %65 = arith.addf %64, %63 : vector<2x128xf32>
    %66 = arith.divf %64, %65 : vector<2x128xf32>
    %67 = vector.extract_strided_slice %66 {offsets = [0, 0], sizes = [2, 32], strides = [1, 1]} : vector<2x128xf32> to vector<2x32xf32>
    %68 = vector.extract_strided_slice %66 {offsets = [0, 32], sizes = [2, 32], strides = [1, 1]} : vector<2x128xf32> to vector<2x32xf32>
    %69 = vector.extract_strided_slice %66 {offsets = [0, 64], sizes = [2, 32], strides = [1, 1]} : vector<2x128xf32> to vector<2x32xf32>
    %70 = vector.extract_strided_slice %61 {offsets = [0, 96], sizes = [2, 32], strides = [1, 1]} : vector<2x128xf32> to vector<2x32xf32>
    %71 = math.tanh %70 : vector<2x32xf32>
    %72 = arith.mulf %68, %51 : vector<2x32xf32>
    %73 = arith.mulf %67, %71 : vector<2x32xf32>
    %74 = arith.addf %72, %73 : vector<2x32xf32>
    %75 = math.tanh %74 : vector<2x32xf32>
    %76 = arith.mulf %69, %75 : vector<2x32xf32>
    %77 = arith.index_cast %57 : i32 to index
    %c0_27 = arith.constant 0 : index
    %78 = vector.load %arg8[%77, %c0_27] : memref<16x32xf32, #tpu.memory_space<vmem>>, vector<2x32xf32>
    tpu.vector_store %arg8[%77, %c0_27], %76 {strides = array<i32>} : memref<16x32xf32, #tpu.memory_space<vmem>>, vector<2x32xf32>,
    %c3_i32 = arith.constant 3 : i32
    %c2_i32_28 = arith.constant 2 : i32
    %79 = arith.muli %c3_i32, %c2_i32_28 : i32
    %80 = tpu.assume_multiple %79, 2 : i32
    %81 = arith.index_cast %80 : i32 to index
    %c0_29 = arith.constant 0 : index
    %82 = vector.load %arg12[%81, %c0_29] : memref<16x128xf32, #tpu.memory_space<vmem>>, vector<2x128xf32>
    %cst_30 = arith.constant dense<0.000000e+00> : vector<2x128xf32>
    %83 = tpu.matmul %76, %0, %cst_30 {dimension_numbers = #tpu.dot_dimension_numbers<[1], [0], [0], [1], [0, 0, 1, 1], [], []>} : vector<2x32xf32>, vector<32x128xf32>, vector<2x128xf32> -> vector<2x128xf32>
    %84 = arith.addf %83, %82 : vector<2x128xf32>
    %85 = arith.negf %84 : vector<2x128xf32>
    %86 = math.exp %85 : vector<2x128xf32>
    %cst_31 = arith.constant 1.000000e+00 : f32
    %87 = vector.broadcast %cst_31 : f32 to vector<2x128xf32>
    %88 = arith.addf %87, %86 : vector<2x128xf32>
    %89 = arith.divf %87, %88 : vector<2x128xf32>
    %90 = vector.extract_strided_slice %89 {offsets = [0, 0], sizes = [2, 32], strides = [1, 1]} : vector<2x128xf32> to vector<2x32xf32>
    %91 = vector.extract_strided_slice %89 {offsets = [0, 32], sizes = [2, 32], strides = [1, 1]} : vector<2x128xf32> to vector<2x32xf32>
    %92 = vector.extract_strided_slice %89 {offsets = [0, 64], sizes = [2, 32], strides = [1, 1]} : vector<2x128xf32> to vector<2x32xf32>
    %93 = vector.extract_strided_slice %84 {offsets = [0, 96], sizes = [2, 32], strides = [1, 1]} : vector<2x128xf32> to vector<2x32xf32>
    %94 = math.tanh %93 : vector<2x32xf32>
    %95 = arith.mulf %91, %74 : vector<2x32xf32>
    %96 = arith.mulf %90, %94 : vector<2x32xf32>
    %97 = arith.addf %95, %96 : vector<2x32xf32>
    %98 = math.tanh %97 : vector<2x32xf32>
    %99 = arith.mulf %92, %98 : vector<2x32xf32>
    %100 = arith.index_cast %80 : i32 to index
    %c0_32 = arith.constant 0 : index
    %101 = vector.load %arg8[%100, %c0_32] : memref<16x32xf32, #tpu.memory_space<vmem>>, vector<2x32xf32>
    tpu.vector_store %arg8[%100, %c0_32], %99 {strides = array<i32>} : memref<16x32xf32, #tpu.memory_space<vmem>>, vector<2x32xf32>,
    %c4_i32 = arith.constant 4 : i32
    %c2_i32_33 = arith.constant 2 : i32
    %102 = arith.muli %c4_i32, %c2_i32_33 : i32
    %103 = tpu.assume_multiple %102, 2 : i32
    %104 = arith.index_cast %103 : i32 to index
    %c0_34 = arith.constant 0 : index
    %105 = vector.load %arg12[%104, %c0_34] : memref<16x128xf32, #tpu.memory_space<vmem>>, vector<2x128xf32>
    %cst_35 = arith.constant dense<0.000000e+00> : vector<2x128xf32>
    %106 = tpu.matmul %99, %0, %cst_35 {dimension_numbers = #tpu.dot_dimension_numbers<[1], [0], [0], [1], [0, 0, 1, 1], [], []>} : vector<2x32xf32>, vector<32x128xf32>, vector<2x128xf32> -> vector<2x128xf32>
    %107 = arith.addf %106, %105 : vector<2x128xf32>
    %108 = arith.negf %107 : vector<2x128xf32>
    %109 = math.exp %108 : vector<2x128xf32>
    %cst_36 = arith.constant 1.000000e+00 : f32
    %110 = vector.broadcast %cst_36 : f32 to vector<2x128xf32>
    %111 = arith.addf %110, %109 : vector<2x128xf32>
    %112 = arith.divf %110, %111 : vector<2x128xf32>
    %113 = vector.extract_strided_slice %112 {offsets = [0, 0], sizes = [2, 32], strides = [1, 1]} : vector<2x128xf32> to vector<2x32xf32>
    %114 = vector.extract_strided_slice %112 {offsets = [0, 32], sizes = [2, 32], strides = [1, 1]} : vector<2x128xf32> to vector<2x32xf32>
    %115 = vector.extract_strided_slice %112 {offsets = [0, 64], sizes = [2, 32], strides = [1, 1]} : vector<2x128xf32> to vector<2x32xf32>
    %116 = vector.extract_strided_slice %107 {offsets = [0, 96], sizes = [2, 32], strides = [1, 1]} : vector<2x128xf32> to vector<2x32xf32>
    %117 = math.tanh %116 : vector<2x32xf32>
    %118 = arith.mulf %114, %97 : vector<2x32xf32>
    %119 = arith.mulf %113, %117 : vector<2x32xf32>
    %120 = arith.addf %118, %119 : vector<2x32xf32>
    %121 = math.tanh %120 : vector<2x32xf32>
    %122 = arith.mulf %115, %121 : vector<2x32xf32>
    %123 = arith.index_cast %103 : i32 to index
    %c0_37 = arith.constant 0 : index
    %124 = vector.load %arg8[%123, %c0_37] : memref<16x32xf32, #tpu.memory_space<vmem>>, vector<2x32xf32>
    tpu.vector_store %arg8[%123, %c0_37], %122 {strides = array<i32>} : memref<16x32xf32, #tpu.memory_space<vmem>>, vector<2x32xf32>,
    %c5_i32 = arith.constant 5 : i32
    %c2_i32_38 = arith.constant 2 : i32
    %125 = arith.muli %c5_i32, %c2_i32_38 : i32
    %126 = tpu.assume_multiple %125, 2 : i32
    %127 = arith.index_cast %126 : i32 to index
    %c0_39 = arith.constant 0 : index
    %128 = vector.load %arg12[%127, %c0_39] : memref<16x128xf32, #tpu.memory_space<vmem>>, vector<2x128xf32>
    %cst_40 = arith.constant dense<0.000000e+00> : vector<2x128xf32>
    %129 = tpu.matmul %122, %0, %cst_40 {dimension_numbers = #tpu.dot_dimension_numbers<[1], [0], [0], [1], [0, 0, 1, 1], [], []>} : vector<2x32xf32>, vector<32x128xf32>, vector<2x128xf32> -> vector<2x128xf32>
    %130 = arith.addf %129, %128 : vector<2x128xf32>
    %131 = arith.negf %130 : vector<2x128xf32>
    %132 = math.exp %131 : vector<2x128xf32>
    %cst_41 = arith.constant 1.000000e+00 : f32
    %133 = vector.broadcast %cst_41 : f32 to vector<2x128xf32>
    %134 = arith.addf %133, %132 : vector<2x128xf32>
    %135 = arith.divf %133, %134 : vector<2x128xf32>
    %136 = vector.extract_strided_slice %135 {offsets = [0, 0], sizes = [2, 32], strides = [1, 1]} : vector<2x128xf32> to vector<2x32xf32>
    %137 = vector.extract_strided_slice %135 {offsets = [0, 32], sizes = [2, 32], strides = [1, 1]} : vector<2x128xf32> to vector<2x32xf32>
    %138 = vector.extract_strided_slice %135 {offsets = [0, 64], sizes = [2, 32], strides = [1, 1]} : vector<2x128xf32> to vector<2x32xf32>
    %139 = vector.extract_strided_slice %130 {offsets = [0, 96], sizes = [2, 32], strides = [1, 1]} : vector<2x128xf32> to vector<2x32xf32>
    %140 = math.tanh %139 : vector<2x32xf32>
    %141 = arith.mulf %137, %120 : vector<2x32xf32>
    %142 = arith.mulf %136, %140 : vector<2x32xf32>
    %143 = arith.addf %141, %142 : vector<2x32xf32>
    %144 = math.tanh %143 : vector<2x32xf32>
    %145 = arith.mulf %138, %144 : vector<2x32xf32>
    %146 = arith.index_cast %126 : i32 to index
    %c0_42 = arith.constant 0 : index
    %147 = vector.load %arg8[%146, %c0_42] : memref<16x32xf32, #tpu.memory_space<vmem>>, vector<2x32xf32>
    tpu.vector_store %arg8[%146, %c0_42], %145 {strides = array<i32>} : memref<16x32xf32, #tpu.memory_space<vmem>>, vector<2x32xf32>,
    %c6_i32 = arith.constant 6 : i32
    %c2_i32_43 = arith.constant 2 : i32
    %148 = arith.muli %c6_i32, %c2_i32_43 : i32
    %149 = tpu.assume_multiple %148, 2 : i32
    %150 = arith.index_cast %149 : i32 to index
    %c0_44 = arith.constant 0 : index
    %151 = vector.load %arg12[%150, %c0_44] : memref<16x128xf32, #tpu.memory_space<vmem>>, vector<2x128xf32>
    %cst_45 = arith.constant dense<0.000000e+00> : vector<2x128xf32>
    %152 = tpu.matmul %145, %0, %cst_45 {dimension_numbers = #tpu.dot_dimension_numbers<[1], [0], [0], [1], [0, 0, 1, 1], [], []>} : vector<2x32xf32>, vector<32x128xf32>, vector<2x128xf32> -> vector<2x128xf32>
    %153 = arith.addf %152, %151 : vector<2x128xf32>
    %154 = arith.negf %153 : vector<2x128xf32>
    %155 = math.exp %154 : vector<2x128xf32>
    %cst_46 = arith.constant 1.000000e+00 : f32
    %156 = vector.broadcast %cst_46 : f32 to vector<2x128xf32>
    %157 = arith.addf %156, %155 : vector<2x128xf32>
    %158 = arith.divf %156, %157 : vector<2x128xf32>
    %159 = vector.extract_strided_slice %158 {offsets = [0, 0], sizes = [2, 32], strides = [1, 1]} : vector<2x128xf32> to vector<2x32xf32>
    %160 = vector.extract_strided_slice %158 {offsets = [0, 32], sizes = [2, 32], strides = [1, 1]} : vector<2x128xf32> to vector<2x32xf32>
    %161 = vector.extract_strided_slice %158 {offsets = [0, 64], sizes = [2, 32], strides = [1, 1]} : vector<2x128xf32> to vector<2x32xf32>
    %162 = vector.extract_strided_slice %153 {offsets = [0, 96], sizes = [2, 32], strides = [1, 1]} : vector<2x128xf32> to vector<2x32xf32>
    %163 = math.tanh %162 : vector<2x32xf32>
    %164 = arith.mulf %160, %143 : vector<2x32xf32>
    %165 = arith.mulf %159, %163 : vector<2x32xf32>
    %166 = arith.addf %164, %165 : vector<2x32xf32>
    %167 = math.tanh %166 : vector<2x32xf32>
    %168 = arith.mulf %161, %167 : vector<2x32xf32>
    %169 = arith.index_cast %149 : i32 to index
    %c0_47 = arith.constant 0 : index
    %170 = vector.load %arg8[%169, %c0_47] : memref<16x32xf32, #tpu.memory_space<vmem>>, vector<2x32xf32>
    tpu.vector_store %arg8[%169, %c0_47], %168 {strides = array<i32>} : memref<16x32xf32, #tpu.memory_space<vmem>>, vector<2x32xf32>,
    %c7_i32 = arith.constant 7 : i32
    %c2_i32_48 = arith.constant 2 : i32
    %171 = arith.muli %c7_i32, %c2_i32_48 : i32
    %172 = tpu.assume_multiple %171, 2 : i32
    %173 = arith.index_cast %172 : i32 to index
    %c0_49 = arith.constant 0 : index
    %174 = vector.load %arg12[%173, %c0_49] : memref<16x128xf32, #tpu.memory_space<vmem>>, vector<2x128xf32>
    %cst_50 = arith.constant dense<0.000000e+00> : vector<2x128xf32>
    %175 = tpu.matmul %168, %0, %cst_50 {dimension_numbers = #tpu.dot_dimension_numbers<[1], [0], [0], [1], [0, 0, 1, 1], [], []>} : vector<2x32xf32>, vector<32x128xf32>, vector<2x128xf32> -> vector<2x128xf32>
    %176 = arith.addf %175, %174 : vector<2x128xf32>
    %177 = arith.negf %176 : vector<2x128xf32>
    %178 = math.exp %177 : vector<2x128xf32>
    %cst_51 = arith.constant 1.000000e+00 : f32
    %179 = vector.broadcast %cst_51 : f32 to vector<2x128xf32>
    %180 = arith.addf %179, %178 : vector<2x128xf32>
    %181 = arith.divf %179, %180 : vector<2x128xf32>
    %182 = vector.extract_strided_slice %181 {offsets = [0, 0], sizes = [2, 32], strides = [1, 1]} : vector<2x128xf32> to vector<2x32xf32>
    %183 = vector.extract_strided_slice %181 {offsets = [0, 32], sizes = [2, 32], strides = [1, 1]} : vector<2x128xf32> to vector<2x32xf32>
    %184 = vector.extract_strided_slice %181 {offsets = [0, 64], sizes = [2, 32], strides = [1, 1]} : vector<2x128xf32> to vector<2x32xf32>
    %185 = vector.extract_strided_slice %176 {offsets = [0, 96], sizes = [2, 32], strides = [1, 1]} : vector<2x128xf32> to vector<2x32xf32>
    %186 = math.tanh %185 : vector<2x32xf32>
    %187 = arith.mulf %183, %166 : vector<2x32xf32>
    %188 = arith.mulf %182, %186 : vector<2x32xf32>
    %189 = arith.addf %187, %188 : vector<2x32xf32>
    %190 = math.tanh %189 : vector<2x32xf32>
    %191 = arith.mulf %184, %190 : vector<2x32xf32>
    %192 = arith.index_cast %172 : i32 to index
    %c0_52 = arith.constant 0 : index
    %193 = vector.load %arg8[%192, %c0_52] : memref<16x32xf32, #tpu.memory_space<vmem>>, vector<2x32xf32>
    tpu.vector_store %arg8[%192, %c0_52], %191 {strides = array<i32>} : memref<16x32xf32, #tpu.memory_space<vmem>>, vector<2x32xf32>,
    %c8_i32 = arith.constant 8 : i32
    %c0_53 = arith.constant 0 : index
    %c0_54 = arith.constant 0 : index
    %194 = vector.load %arg10[%c0_53, %c0_54] : memref<2x32xf32, #tpu.memory_space<vmem>>, vector<2x32xf32>
    tpu.vector_store %arg10[%c0_53, %c0_54], %191 {strides = array<i32>} : memref<2x32xf32, #tpu.memory_space<vmem>>, vector<2x32xf32>,
    %c0_55 = arith.constant 0 : index
    %c0_56 = arith.constant 0 : index
    %195 = vector.load %arg11[%c0_55, %c0_56] : memref<2x32xf32, #tpu.memory_space<vmem>>, vector<2x32xf32>
    tpu.vector_store %arg11[%c0_55, %c0_56], %189 {strides = array<i32>} : memref<2x32xf32, #tpu.memory_space<vmem>>, vector<2x32xf32>,
    %c0_57 = arith.constant 0 : index
    %c0_58 = arith.constant 0 : index
    %196 = vector.load %arg8[%c0_57, %c0_58] : memref<16x32xf32, #tpu.memory_space<vmem>>, vector<16x32xf32>
    %c0_59 = arith.constant 0 : index
    %c0_60 = arith.constant 0 : index
    %197 = vector.load %arg6[%c0_59, %c0_60] : memref<1x32xf32, #tpu.memory_space<vmem>>, vector<1x32xf32>
    %198 = vector.broadcast %197 : vector<1x32xf32> to vector<16x32xf32>
    %199 = arith.mulf %196, %198 : vector<16x32xf32>
    %cst_61 = arith.constant dense<0.000000e+00> : vector<16xf32>
    %200 = vector.multi_reduction <add>, %199, %cst_61 [1] : vector<16x32xf32> to vector<16xf32>
    %201 = vector.shape_cast %200 : vector<16xf32> to vector<16x1xf32>
    %c0_62 = arith.constant 0 : index
    %c0_63 = arith.constant 0 : index
    %202 = vector.load %arg7[%c0_62, %c0_63] : memref<1x1xf32, #tpu.memory_space<vmem>>, vector<1x1xf32>
    %203 = vector.broadcast %202 : vector<1x1xf32> to vector<16x1xf32>
    %204 = arith.addf %201, %203 : vector<16x1xf32>
    %c0_64 = arith.constant 0 : index
    %c0_65 = arith.constant 0 : index
    %205 = vector.load %arg9[%c0_64, %c0_65] : memref<16x1xf32, #tpu.memory_space<vmem>>, vector<16x1xf32>
    tpu.vector_store %arg9[%c0_64, %c0_65], %204 {strides = array<i32>} : memref<16x1xf32, #tpu.memory_space<vmem>>, vector<16x1xf32>,
    return
  }
}

</mosaic_0001>

<bundles_post_ra>
// kernel: tpu_custom_call.1
= control target key start
LH: loop header
LB: loop body
LE: loop exit
PB: predicated region body
PF: predicated region fallthrough
CT: control target
= control target key end

     0   :  { %s1715_s0 = inlined_call_operand.vmem [shape: f32[16,5], index: 0, kind: input, shape index: {}]   ;;  %s1716_s1 = inlined_call_operand.vmem [shape: f32[2,32], index: 1, kind: input, shape index: {}]   ;;  %s1717_s2 = inlined_call_operand.hbm [shape: f32[2,32], index: 2, kind: input, shape index: {}]   ;;  %s1718_s3 = inlined_call_operand.vmem [shape: f32[32,128], index: 3, kind: input, shape index: {}]   ;;  %s1719_s4 = inlined_call_operand.vmem [shape: f32[5,128], index: 4, kind: input, shape index: {}]   ;;  %s1720_s5 = inlined_call_operand.vmem [shape: f32[1,128], index: 5, kind: input, shape index: {}]   ;;  %s1721_s6 = inlined_call_operand.vmem [shape: f32[1,32], index: 6, kind: input, shape index: {}]   ;;  %s1722_s7 = inlined_call_operand.<no memory space> [shape: f32[1,1], index: 7, kind: input, shape index: {}]   ;;  %s1723_s8 = inlined_call_operand.hbm [shape: f32[16,32], index: 8, kind: output, shape index: {0}]   ;;  %s1724_s9 = inlined_call_operand.vmem [shape: f32[16,1], index: 9, kind: output, shape index: {1}]   ;;  %s1725_s10 = inlined_call_operand.hbm [shape: f32[2,32], index: 10, kind: output, shape index: {2}]   ;;  %s1726_s11 = inlined_call_operand.hbm [shape: f32[2,32], index: 11, kind: output, shape index: {3}]  }
   0x1   :  { %v17_v0 = vstv %s1722_s7 }
   0x2   :  { %18 = vst [vmem:[#allocation3] sm:$0x1] %v17_v0 }
   0x3   :  { %19 = vsyncpa [#allocation5], 0 }
   0x4   :  { %20 = vsyncpa [#allocation6], 0 }
   0x5   :  { %21 = vsyncpa [#allocation9], 0  ;;  %s1449_s19 = smov [#allocation4]   ;;  %s1355_s23 = scalar_lea.hbm %s1717_s2, 32 }
   0x6   :  { %s32_s20 = sshll.u32 %s1449_s19, 4  ;;  %p1356_p0 = scmp.ne.s32.totalorder %s1717_s2, %s1355_s23  ;;  %s33_s20 = int_to_ptr.vmem [resolvable:$true] %s32_s20 }
   0x7   :  { %p1359_p1 = scmp.lt.u32.totalorder %s1355_s23, %s1717_s2 }
   0x9   :  { %p1361_p2 = pnand %p1359_p1, %p1356_p0 }
   0xb   :  { %1364 = shalt.err (!%p1361_p2)
}
   0xc   :  { %s1365_s7 = scalar_lea.vmem %s33_s20, 32  ;;  %p1370_p4 = scmp.lt.s32.totalorder %s33_s20, %s33_s20 }
   0xd   :  { %p1366_p3 = scmp.ne.s32.totalorder %s33_s20, %s1365_s7  ;;  %p1371_p5 = scmp.lt.s32.totalorder %s1365_s7, %s1365_s7 }
   0xf   :  { %p1372_p6 = por %p1371_p5, %p1370_p4 }
  0x11   :  { %p1373_p7 = pnand %p1372_p6, %p1366_p3 }
  0x13   :  { %1376 = shalt.err (!%p1373_p7)
}
  0x14   :  { %35 = dma.hbm_to_vmem [thread:$0]  %s1717_s2, 32, %s33_s20, [#allocation5]  }
  0x15   :  { %1443 = dma.done.wait [#allocation5], 32  }
  0x16   :  { %1444 = vsyncadd [#allocation5], 4294967264  ;;  %v1450_v1 = vmov 0.0|0.0   ;;  %vm1451_vm0 = vmmov 0   ;;  %v1452_v2 = vmov 0.0   ;;  %vm70_vm1 = vcmask 1044480  }
  0x17   :  { %1231 = vmatprep.subr.bf16.mxu1 %v1450_v1  ;;  %1151 = vmatprep.mubr.msk.f32.mxu1 %vm1451_vm0, %v1452_v2  ;;  %vm63_vm2 = vcmask 39936   ;;  %v55_v3 = vld [vmem:[%s1719_s4] sm:$0x1f]  ;;  %v54_v5 = vld [vmem:[%s1715_s0 + $0x8] sm:$0xff]  ;;  %v51_v8 = vld [vmem:[%s1718_s3 + $0x10] sm:$0xff]  ;;  %vm154_vm3 = vcmask 261120  }
  0x18   :  { %v53_v4 = vld [vmem:[%s1715_s0] sm:$0xff]  ;;  %1138 = vmatprep.subr.msk.mxu0 %vm70_vm1, %v55_v3  ;;  %v50_v7 = vld [vmem:[%s1718_s3 + $0x8] sm:$0xff]  ;;  %v52_v10 = vld [vmem:[%s1718_s3 + $0x18] sm:$0xff]  ;;  %s1453_s24 = smov 32   ;;  %vm260_vm4 = vcmask 254976   ;;  %vm1022_vm5 = vcmask 7168  }
  0x19   :  { %1140 = vmatprep.mubr.msk.f32.mxu0 %vm63_vm2, %v53_v4  ;;  %v49_v6 = vld [vmem:[%s1718_s3] sm:$0xff]  ;;  %1139 = vmatpush3.msk.msra.mxu0 %vm70_vm1, %v55_v3  ;;  %v1564_v11 = vpack.c.bf16 %v52_v10, %v51_v8  ;;  %v152_v23 = vld [vmem:[#allocation4] sm:$0x3]  ;;  %s1456_s29 = smov [#allocation7]  }
  0x1a   :  { %v1557_v9 = vpack.c.bf16 %v50_v7, %v49_v6  ;;  %1141 = vmatmul.mubr.msk.f32.vlgmr.msra.gmra.mrb[0].mxu0 %vm63_vm2, %v54_v5  ;;  %1237 = vmatprep.subr.bf16.mxu0 %v1450_v1  ;;  %v151_v12 = vld [vmem:[%s1716_s1] sm:$0x3]  ;;  %s1030_s30 = sshll.u32 %s1456_s29, 4  ;;  %s1031_s30 = int_to_ptr.vmem [resolvable:$true] %s1030_s30 }
  0x1b   :  { %1162 = vmatprep.mubr.msk.f32.mxu0 %vm1451_vm0, %v1452_v2  ;;  %v1073_v13 = vld [vmem:[%s1720_s5] ss:$0 sm:$0xff]  ;;  %s1454_s5 = smov 64  }
  0x1c   :  { %1233 = vmatpush3.bf16.msra.mxu1 %v1557_v9  ;;  %1239 = vmatpush3.bf16.msra.mxu0 %v1557_v9 }
  0x1d   :  { %1234 = vmatprep.subr.bf16.mxu1 %v1450_v1  ;;  %1240 = vmatprep.subr.bf16.mxu0 %v1450_v1 }
  0x20   :  { %1236 = vmatpush3.bf16.msra.mxu1 %v1564_v11  ;;  %1242 = vmatpush3.bf16.msra.mxu0 %v1564_v11 }
  0x21   :  { %1243 = vmatprep.subr.bf16.mxu1 %v1450_v1  ;;  %1249 = vmatprep.subr.bf16.mxu0 %v1450_v1 }
  0x23   :  { %1152 = vmatmul.mubr.msk.f32.vlgmr.msra.gmra.mrb[0].mxu1 %vm154_vm3, %v151_v12 }
  0x24   :  { %1245 = vmatpush3.bf16.msra.mxu1 %v1557_v9  ;;  %1173 = vmatprep.mubr.msk.f32.mxu1 %vm1451_vm0, %v1452_v2 }
  0x25   :  { %1246 = vmatprep.subr.bf16.mxu1 %v1450_v1 }
  0x28   :  { %1248 = vmatpush3.bf16.msra.mxu1 %v1564_v11 }
  0x29   :  { %1255 = vmatprep.subr.bf16.mxu1 %v1450_v1 }
  0xed   :  { %v1142_v14 = vpop.f32.mrb[0].mxu0 }
  0xee   :  { %v146_v15 = vadd.f32 %v1142_v14, %v1073_v13  ;;  %v140_v16 = vpop.f32.mrb[1].mxu0 }
  0xef   :  { %v141_v17 = vadd.f32 %v1073_v13, %v140_v16 }
  0xf0   :  { %150 = vst [vmem:[#allocation2 + $0x8] sm:$0xff] %v146_v15 }
  0xf1   :  { %149 = vst [vmem:[#allocation2] sm:$0xff] %v141_v17 }
  0xf6   :  { %v224_v18 = vpop.f32.mrb[0].mxu1 }
  0xf7   :  { %v1153_v19 = vpop.f32.mrb[1].mxu1 }
  0xf8   :  { %v153_v20 = vld [vmem:[#allocation2] sm:$0x3]  ;;  %v263_v38 = vld [vmem:[#allocation2 + $0x2] sm:$0x3]  ;;  %v367_v56 = vld [vmem:[#allocation2 + $0x4] sm:$0x3] }
  0xf9   :  { %v225_v21 = vadd.f32 %v224_v18, %v153_v20  ;;  %v471_v14 = vld [vmem:[#allocation2 + $0x6] sm:$0x3] }
  0xfb   :  { %1291 = vtanh.f32 %v225_v21  ;;  %v1078_v24 = vmul.f32 -1.442695, %v225_v21 }
  0xfd   :  { %1293 = vpow2.f32 %v1078_v24 }
 0x105   :  { %v1292_v22 = vpop.eup %1291 }
 0x106   :  { %241 = vrot.lane.b32.xlu0 %v1292_v22, %s1453_s24 }
 0x107   :  { %v1294_v25 = vpop.eup %1293 }
 0x108   :  { %v231_v26 = vadd.f32 1.0, %v1294_v25 }
 0x10a   :  { %236 = vrot.lane.b32.xlu0 %v152_v23, %s1453_s24  ;;  %1295 = vrcp.f32 %v231_v26 }
 0x114   :  { %v1296_v27 = vpop.eup %1295 }
 0x178   :  { %v242_v28 = vpop.permute.xlu0 %241 }
 0x179   :  { %v244_v29 = vmul.f32 %v1296_v27, %v242_v28 }
 0x17b   :  { %246 = vrot.lane.b32.xlu1 %v244_v29, %s1453_s24 }
 0x17c   :  { %v237_v30 = vpop.permute.xlu0 %236 }
 0x17d   :  { %v239_v31 = vmul.f32 %v1296_v27, %v237_v30 }
 0x1ed   :  { %v247_v32 = vpop.permute.xlu1 %246 }
 0x1ee   :  { %v249_v33 = vadd.f32 %v247_v32, %v239_v31  ;;  %v575_v32 = vld [vmem:[#allocation2 + $0x8] sm:$0x3] }
 0x1f0   :  { %1297 = vtanh.f32 %v249_v33 }
 0x1fa   :  { %v1298_v34 = vpop.eup %1297 }
 0x1fb   :  { %252 = vrot.lane.b32.xlu1 %v1298_v34, %s1453_s24 }
 0x26d   :  { %v253_v35 = vpop.permute.xlu1 %252 }
 0x26e   :  { %v255_v36 = vmul.f32 %v1296_v27, %v253_v35 }
 0x270   :  { %257 = vrot.lane.b32.xlu0 %v255_v36, %s1454_s5 }
 0x2e2   :  { %v258_v37 = vpop.permute.xlu0 %257 }
 0x2e3   :  { %261 = vst.msk [vmem:[#allocation7] sm:$0x3] %vm260_vm4, %v258_v37  ;;  %1163 = vmatmul.mubr.msk.f32.vlgmr.msra.gmra.mrb[2].mxu0 %vm154_vm3, %v258_v37 }
 0x2e4   :  { %1251 = vmatpush3.bf16.msra.mxu0 %v1557_v9  ;;  %1184 = vmatprep.mubr.msk.f32.mxu0 %vm1451_vm0, %v1452_v2 }
 0x2e5   :  { %1252 = vmatprep.subr.bf16.mxu0 %v1450_v1 }
 0x2e8   :  { %1254 = vmatpush3.bf16.msra.mxu0 %v1564_v11 }
 0x2e9   :  { %1261 = vmatprep.subr.bf16.mxu0 %v1450_v1 }
 0x3b6   :  { %v332_v39 = vpop.f32.mrb[2].mxu0 }
 0x3b7   :  { %v333_v40 = vadd.f32 %v332_v39, %v263_v38  ;;  %v1164_v41 = vpop.f32.mrb[3].mxu0 }
 0x3b9   :  { %1299 = vtanh.f32 %v333_v40  ;;  %v1080_v43 = vmul.f32 -1.442695, %v333_v40 }
 0x3bb   :  { %1301 = vpow2.f32 %v1080_v43 }
 0x3c3   :  { %v1300_v42 = vpop.eup %1299 }
 0x3c4   :  { %345 = vrot.lane.b32.xlu1 %v1300_v42, %s1453_s24 }
 0x3c5   :  { %v1302_v44 = vpop.eup %1301 }
 0x3c6   :  { %v339_v45 = vadd.f32 1.0, %v1302_v44 }
 0x3c8   :  { %1303 = vrcp.f32 %v339_v45 }
 0x3d2   :  { %v1304_v46 = vpop.eup %1303 }
 0x3d3   :  { %v343_v49 = vmul.f32 %v1304_v46, %v249_v33 }
 0x436   :  { %v346_v47 = vpop.permute.xlu1 %345 }
 0x437   :  { %v348_v48 = vmul.f32 %v1304_v46, %v346_v47 }
 0x439   :  { %350 = vrot.lane.b32.xlu0 %v348_v48, %s1453_s24 }
 0x4ab   :  { %v351_v50 = vpop.permute.xlu0 %350 }
 0x4ac   :  { %v353_v51 = vadd.f32 %v351_v50, %v343_v49  ;;  %v679_v50 = vld [vmem:[#allocation2 + $0xa] sm:$0x3] }
 0x4ae   :  { %1305 = vtanh.f32 %v353_v51 }
 0x4b8   :  { %v1306_v52 = vpop.eup %1305 }
 0x4b9   :  { %356 = vrot.lane.b32.xlu1 %v1306_v52, %s1453_s24 }
 0x52b   :  { %v357_v53 = vpop.permute.xlu1 %356 }
 0x52c   :  { %v359_v54 = vmul.f32 %v1304_v46, %v357_v53 }
 0x52e   :  { %361 = vrot.lane.b32.xlu0 %v359_v54, %s1454_s5 }
 0x5a0   :  { %v362_v55 = vpop.permute.xlu0 %361 }
 0x5a1   :  { %365 = vst.msk [vmem:[#allocation7 + $0x2] sm:$0x3] %vm260_vm4, %v362_v55  ;;  %1174 = vmatmul.mubr.msk.f32.vlgmr.msra.gmra.mrb[2].mxu1 %vm154_vm3, %v362_v55 }
 0x5a2   :  { %1257 = vmatpush3.bf16.msra.mxu1 %v1557_v9  ;;  %1195 = vmatprep.mubr.msk.f32.mxu1 %vm1451_vm0, %v1452_v2 }
 0x5a3   :  { %1258 = vmatprep.subr.bf16.mxu1 %v1450_v1 }
 0x5a6   :  { %1260 = vmatpush3.bf16.msra.mxu1 %v1564_v11 }
 0x5a7   :  { %1267 = vmatprep.subr.bf16.mxu1 %v1450_v1 }
 0x674   :  { %v436_v57 = vpop.f32.mrb[2].mxu1 }
 0x675   :  { %v437_v58 = vadd.f32 %v436_v57, %v367_v56  ;;  %v1175_v59 = vpop.f32.mrb[3].mxu1 }
 0x677   :  { %1307 = vtanh.f32 %v437_v58  ;;  %v1082_v61 = vmul.f32 -1.442695, %v437_v58 }
 0x679   :  { %1309 = vpow2.f32 %v1082_v61 }
 0x681   :  { %v1308_v60 = vpop.eup %1307 }
 0x682   :  { %449 = vrot.lane.b32.xlu1 %v1308_v60, %s1453_s24 }
 0x683   :  { %v1310_v62 = vpop.eup %1309 }
 0x684   :  { %v443_v63 = vadd.f32 1.0, %v1310_v62 }
 0x686   :  { %1311 = vrcp.f32 %v443_v63 }
 0x690   :  { %v1312_v0 = vpop.eup %1311 }
 0x691   :  { %v447_v5 = vmul.f32 %v1312_v0, %v353_v51 }
 0x6f4   :  { %v450_v3 = vpop.permute.xlu1 %449 }
 0x6f5   :  { %v452_v4 = vmul.f32 %v1312_v0, %v450_v3 }
 0x6f7   :  { %454 = vrot.lane.b32.xlu0 %v452_v4, %s1453_s24 }
 0x769   :  { %v455_v6 = vpop.permute.xlu0 %454 }
 0x76a   :  { %v457_v7 = vadd.f32 %v455_v6, %v447_v5 }
 0x76c   :  { %1313 = vtanh.f32 %v457_v7 }
 0x776   :  { %v1314_v8 = vpop.eup %1313 }
 0x777   :  { %460 = vrot.lane.b32.xlu1 %v1314_v8, %s1453_s24 }
 0x7e9   :  { %v461_v10 = vpop.permute.xlu1 %460 }
 0x7ea   :  { %v463_v12 = vmul.f32 %v1312_v0, %v461_v10  ;;  %v783_v0 = vld [vmem:[#allocation2 + $0xc] sm:$0x3] }
 0x7ec   :  { %465 = vrot.lane.b32.xlu0 %v463_v12, %s1454_s5 }
 0x85e   :  { %v466_v13 = vpop.permute.xlu0 %465 }
 0x85f   :  { %469 = vst.msk [vmem:[#allocation7 + $0x4] sm:$0x3] %vm260_vm4, %v466_v13  ;;  %1185 = vmatmul.mubr.msk.f32.vlgmr.msra.gmra.mrb[4].mxu0 %vm154_vm3, %v466_v13 }
 0x860   :  { %1263 = vmatpush3.bf16.msra.mxu0 %v1557_v9  ;;  %1206 = vmatprep.mubr.msk.f32.mxu0 %vm1451_vm0, %v1452_v2 }
 0x861   :  { %1264 = vmatprep.subr.bf16.mxu0 %v1450_v1 }
 0x864   :  { %1266 = vmatpush3.bf16.msra.mxu0 %v1564_v11 }
 0x865   :  { %1273 = vmatprep.subr.bf16.mxu0 %v1450_v1 }
 0x932   :  { %v540_v15 = vpop.f32.mrb[4].mxu0 }
 0x933   :  { %v541_v16 = vadd.f32 %v540_v15, %v471_v14  ;;  %v1186_v17 = vpop.f32.mrb[5].mxu0 }
 0x935   :  { %1315 = vtanh.f32 %v541_v16  ;;  %v1084_v19 = vmul.f32 -1.442695, %v541_v16 }
 0x937   :  { %1317 = vpow2.f32 %v1084_v19 }
 0x93f   :  { %v1316_v18 = vpop.eup %1315 }
 0x940   :  { %553 = vrot.lane.b32.xlu1 %v1316_v18, %s1453_s24 }
 0x941   :  { %v1318_v20 = vpop.eup %1317 }
 0x942   :  { %v547_v21 = vadd.f32 1.0, %v1318_v20 }
 0x944   :  { %1319 = vrcp.f32 %v547_v21 }
 0x94e   :  { %v1320_v22 = vpop.eup %1319 }
 0x94f   :  { %v551_v25 = vmul.f32 %v1320_v22, %v457_v7 }
 0x9b2   :  { %v554_v23 = vpop.permute.xlu1 %553 }
 0x9b3   :  { %v556_v24 = vmul.f32 %v1320_v22, %v554_v23 }
 0x9b5   :  { %558 = vrot.lane.b32.xlu0 %v556_v24, %s1453_s24 }
 0xa27   :  { %v559_v26 = vpop.permute.xlu0 %558 }
 0xa28   :  { %v561_v27 = vadd.f32 %v559_v26, %v551_v25 }
 0xa2a   :  { %1321 = vtanh.f32 %v561_v27 }
 0xa34   :  { %v1322_v28 = vpop.eup %1321 }
 0xa35   :  { %564 = vrot.lane.b32.xlu1 %v1322_v28, %s1453_s24 }
 0xaa7   :  { %v565_v29 = vpop.permute.xlu1 %564 }
 0xaa8   :  { %v567_v30 = vmul.f32 %v1320_v22, %v565_v29  ;;  %v887_v22 = vld [vmem:[#allocation2 + $0xe] sm:$0x3] }
 0xaaa   :  { %569 = vrot.lane.b32.xlu0 %v567_v30, %s1454_s5 }
 0xb1c   :  { %v570_v31 = vpop.permute.xlu0 %569 }
 0xb1d   :  { %573 = vst.msk [vmem:[#allocation7 + $0x6] sm:$0x3] %vm260_vm4, %v570_v31  ;;  %1196 = vmatmul.mubr.msk.f32.vlgmr.msra.gmra.mrb[4].mxu1 %vm154_vm3, %v570_v31 }
 0xb1e   :  { %1269 = vmatpush3.bf16.msra.mxu1 %v1557_v9  ;;  %1217 = vmatprep.mubr.msk.f32.mxu1 %vm1451_vm0, %v1452_v2 }
 0xb1f   :  { %1270 = vmatprep.subr.bf16.mxu1 %v1450_v1 }
 0xb22   :  { %1272 = vmatpush3.bf16.msra.mxu1 %v1564_v11 }
 0xbf0   :  { %v644_v33 = vpop.f32.mrb[4].mxu1 }
 0xbf1   :  { %v645_v34 = vadd.f32 %v644_v33, %v575_v32  ;;  %v1197_v35 = vpop.f32.mrb[5].mxu1 }
 0xbf3   :  { %1323 = vtanh.f32 %v645_v34  ;;  %v1086_v37 = vmul.f32 -1.442695, %v645_v34 }
 0xbf5   :  { %1325 = vpow2.f32 %v1086_v37  ;;  %v996_v37 = vld [vmem:[#allocation7] sm:$0xff] }
 0xbfd   :  { %v1324_v36 = vpop.eup %1323 }
 0xbfe   :  { %657 = vrot.lane.b32.xlu1 %v1324_v36, %s1453_s24 }
 0xbff   :  { %v1326_v38 = vpop.eup %1325 }
 0xc00   :  { %v651_v39 = vadd.f32 1.0, %v1326_v38  ;;  %v1093_v38 = vld [vmem:[%s1721_s6] ss:$0 sm:$0xff]  ;;  %s1455_s6 = smov [#allocation8]  }
 0xc01   :  { %s1045_s28 = sshll.u32 %s1455_s6, 4  ;;  %s1046_s28 = int_to_ptr.vmem [resolvable:$true] %s1045_s28 }
 0xc02   :  { %1327 = vrcp.f32 %v651_v39  ;;  %v1005_v39 = vmul.f32 %v1093_v38, %v996_v37  ;;  %s1377_s12 = scalar_lea.vmem %s1046_s28, 32  ;;  %p1382_p9 = scmp.lt.s32.totalorder %s1046_s28, %s1046_s28 }
 0xc03   :  { %p1378_p8 = scmp.ne.s32.totalorder %s1046_s28, %s1377_s12  ;;  %p1383_p10 = scmp.lt.s32.totalorder %s1377_s12, %s1377_s12 }
 0xc05   :  { %p1384_p11 = por %p1383_p10, %p1382_p9 }
 0xc07   :  { %p1385_p12 = pnand %p1384_p11, %p1378_p8 }
 0xc0c   :  { %v1328_v40 = vpop.eup %1327 }
 0xc0d   :  { %v655_v43 = vmul.f32 %v1328_v40, %v561_v27 }
 0xc70   :  { %v658_v41 = vpop.permute.xlu1 %657 }
 0xc71   :  { %v660_v42 = vmul.f32 %v1328_v40, %v658_v41 }
 0xc73   :  { %662 = vrot.lane.b32.xlu0 %v660_v42, %s1453_s24 }
 0xce5   :  { %v663_v44 = vpop.permute.xlu0 %662 }
 0xce6   :  { %v665_v45 = vadd.f32 %v663_v44, %v655_v43  ;;  %v1094_v43 = vld [vmem:[#allocation3] ss:$0 sm:$0xff] }
 0xce8   :  { %1329 = vtanh.f32 %v665_v45 }
 0xcf2   :  { %v1330_v46 = vpop.eup %1329 }
 0xcf3   :  { %668 = vrot.lane.b32.xlu1 %v1330_v46, %s1453_s24 }
 0xd65   :  { %v669_v47 = vpop.permute.xlu1 %668 }
 0xd66   :  { %v671_v48 = vmul.f32 %v1328_v40, %v669_v47  ;;  %v1007_v40 = vsel %vm154_vm3, %v1005_v39, 0.0 }
 0xd68   :  { %673 = vrot.lane.b32.xlu0 %v671_v48, %s1454_s5 }
 0xdda   :  { %v674_v49 = vpop.permute.xlu0 %673 }
 0xddb   :  { %677 = vst.msk [vmem:[#allocation7 + $0x8] sm:$0x3] %vm260_vm4, %v674_v49  ;;  %1207 = vmatmul.mubr.msk.f32.vlgmr.msra.gmra.mrb[6].mxu0 %vm154_vm3, %v674_v49 }
 0xddc   :  { %1275 = vmatpush3.bf16.msra.mxu0 %v1557_v9  ;;  %1228 = vmatprep.mubr.msk.f32.mxu0 %vm1451_vm0, %v1452_v2 }
 0xddd   :  { %1276 = vmatprep.subr.bf16.mxu0 %v1450_v1 }
 0xde0   :  { %1278 = vmatpush3.bf16.msra.mxu0 %v1564_v11 }
 0xeae   :  { %v748_v51 = vpop.f32.mrb[6].mxu0 }
 0xeaf   :  { %v749_v52 = vadd.f32 %v748_v51, %v679_v50  ;;  %v1208_v53 = vpop.f32.mrb[7].mxu0 }
 0xeb1   :  { %1331 = vtanh.f32 %v749_v52  ;;  %v1088_v55 = vmul.f32 -1.442695, %v749_v52 }
 0xeb3   :  { %1333 = vpow2.f32 %v1088_v55 }
 0xebb   :  { %v1332_v54 = vpop.eup %1331 }
 0xebc   :  { %761 = vrot.lane.b32.xlu1 %v1332_v54, %s1453_s24 }
 0xebd   :  { %v1334_v56 = vpop.eup %1333 }
 0xebe   :  { %v755_v57 = vadd.f32 1.0, %v1334_v56 }
 0xec0   :  { %1335 = vrcp.f32 %v755_v57 }
 0xeca   :  { %v1336_v9 = vpop.eup %1335 }
 0xecb   :  { %v759_v1 = vmul.f32 %v1336_v9, %v665_v45 }
 0xf2e   :  { %v762_v58 = vpop.permute.xlu1 %761 }
 0xf2f   :  { %v764_v2 = vmul.f32 %v1336_v9, %v762_v58 }
 0xf31   :  { %766 = vrot.lane.b32.xlu0 %v764_v2, %s1453_s24 }
 0xfa3   :  { %v767_v11 = vpop.permute.xlu0 %766 }
 0xfa4   :  { %v769_v59 = vadd.f32 %v767_v11, %v759_v1 }
 0xfa6   :  { %1337 = vtanh.f32 %v769_v59 }
 0xfb0   :  { %v1338_v60 = vpop.eup %1337 }
 0xfb1   :  { %772 = vrot.lane.b32.xlu1 %v1338_v60, %s1453_s24 }
0x1023   :  { %v773_v61 = vpop.permute.xlu1 %772 }
0x1024   :  { %v775_v62 = vmul.f32 %v1336_v9, %v773_v61 }
0x1026   :  { %777 = vrot.lane.b32.xlu0 %v775_v62, %s1454_s5 }
0x1098   :  { %v778_v63 = vpop.permute.xlu0 %777 }
0x1099   :  { %781 = vst.msk [vmem:[#allocation7 + $0xa] sm:$0x3] %vm260_vm4, %v778_v63  ;;  %1218 = vmatmul.mubr.msk.f32.vlgmr.msra.gmra.mrb[6].mxu1 %vm154_vm3, %v778_v63 }
0x116c   :  { %v852_v3 = vpop.f32.mrb[6].mxu1 }
0x116d   :  { %v853_v4 = vadd.f32 %v852_v3, %v783_v0  ;;  %v1219_v5 = vpop.f32.mrb[7].mxu1 }
0x116f   :  { %1339 = vtanh.f32 %v853_v4  ;;  %v1090_v7 = vmul.f32 -1.442695, %v853_v4 }
0x1171   :  { %1341 = vpow2.f32 %v1090_v7 }
0x1179   :  { %v1340_v6 = vpop.eup %1339 }
0x117a   :  { %865 = vrot.lane.b32.xlu1 %v1340_v6, %s1453_s24 }
0x117b   :  { %v1342_v8 = vpop.eup %1341 }
0x117c   :  { %v859_v10 = vadd.f32 1.0, %v1342_v8 }
0x117e   :  { %1343 = vrcp.f32 %v859_v10 }
0x1188   :  { %v1344_v12 = vpop.eup %1343 }
0x1189   :  { %v863_v15 = vmul.f32 %v1344_v12, %v769_v59 }
0x11ec   :  { %v866_v13 = vpop.permute.xlu1 %865 }
0x11ed   :  { %v868_v14 = vmul.f32 %v1344_v12, %v866_v13 }
0x11ef   :  { %870 = vrot.lane.b32.xlu0 %v868_v14, %s1453_s24 }
0x1261   :  { %v871_v16 = vpop.permute.xlu0 %870 }
0x1262   :  { %v873_v17 = vadd.f32 %v871_v16, %v863_v15 }
0x1264   :  { %1345 = vtanh.f32 %v873_v17 }
0x126e   :  { %v1346_v18 = vpop.eup %1345 }
0x126f   :  { %876 = vrot.lane.b32.xlu1 %v1346_v18, %s1453_s24 }
0x12e1   :  { %v877_v19 = vpop.permute.xlu1 %876 }
0x12e2   :  { %v879_v20 = vmul.f32 %v1344_v12, %v877_v19 }
0x12e4   :  { %881 = vrot.lane.b32.xlu0 %v879_v20, %s1454_s5 }
0x1356   :  { %v882_v21 = vpop.permute.xlu0 %881 }
0x1357   :  { %885 = vst.msk [vmem:[#allocation7 + $0xc] sm:$0x3] %vm260_vm4, %v882_v21  ;;  %1229 = vmatmul.mubr.msk.f32.vlgmr.msra.gmra.mrb[8].mxu0 %vm154_vm3, %v882_v21 }
0x142a   :  { %v956_v23 = vpop.f32.mrb[8].mxu0 }
0x142b   :  { %v957_v24 = vadd.f32 %v956_v23, %v887_v22  ;;  %v1230_v25 = vpop.f32.mrb[9].mxu0 }
0x142d   :  { %1347 = vtanh.f32 %v957_v24  ;;  %v1092_v27 = vmul.f32 -1.442695, %v957_v24 }
0x142f   :  { %1349 = vpow2.f32 %v1092_v27 }
0x1437   :  { %v1348_v26 = vpop.eup %1347 }
0x1438   :  { %969 = vrot.lane.b32.xlu1 %v1348_v26, %s1453_s24 }
0x1439   :  { %v1350_v28 = vpop.eup %1349 }
0x143a   :  { %v963_v29 = vadd.f32 1.0, %v1350_v28 }
0x143c   :  { %1351 = vrcp.f32 %v963_v29 }
0x1446   :  { %v1352_v30 = vpop.eup %1351 }
0x1447   :  { %v967_v33 = vmul.f32 %v1352_v30, %v873_v17 }
0x14aa   :  { %v970_v31 = vpop.permute.xlu1 %969 }
0x14ab   :  { %v972_v32 = vmul.f32 %v1352_v30, %v970_v31 }
0x14ad   :  { %974 = vrot.lane.b32.xlu0 %v972_v32, %s1453_s24 }
0x151f   :  { %v975_v34 = vpop.permute.xlu0 %974 }
0x1520   :  { %v977_v35 = vadd.f32 %v975_v34, %v967_v33 }
0x1522   :  { %1353 = vtanh.f32 %v977_v35 }
0x152c   :  { %v1354_v36 = vpop.eup %1353 }
0x152d   :  { %980 = vrot.lane.b32.xlu1 %v1354_v36, %s1453_s24 }
0x1551   :  { %1008 = vadd.xlane.f32.xlu1 %v1007_v40 }
0x159f   :  { %v981_v41 = vpop.permute.xlu1 %980 }
0x15a0   :  { %v983_v42 = vmul.f32 %v1352_v30, %v981_v41 }
0x15a2   :  { %985 = vrot.lane.b32.xlu0 %v983_v42, %s1454_s5 }
0x15de   :  { %v1009_v44 = vpop.xlane.xlu1 %1008 }
0x15df   :  { %v1020_v45 = vadd.f32 %v1094_v43, %v1009_v44 }
0x15e1   :  { %1023 = vst.msk [vmem:[%s1724_s9] sm:$0xff] %vm1022_vm5, %v1020_v45 }
0x1614   :  { %v986_v46 = vpop.permute.xlu0 %985 }
0x1615   :  { %989 = vst.msk [vmem:[#allocation7 + $0xe] sm:$0x3] %vm260_vm4, %v986_v46  ;;  %990 = vst.msk [vmem:[#allocation8] sm:$0x3] %vm260_vm4, %v986_v46 }
0x161c   :  { %v997_v47 = vld [vmem:[#allocation7 + $0x8] sm:$0xff] }
0x161d   :  { %v1006_v48 = vmul.f32 %v1093_v38, %v997_v47 }
0x161f   :  { %v1010_v49 = vsel %vm154_vm3, %v1006_v48, 0.0 }
0x1620   :  { %1011 = vadd.xlane.f32.xlu0 %v1010_v49 }
0x1621   :  { %1388 = shalt.err (!%p1385_p12)
}
0x1622   :  { %s1389_s2 = scalar_lea.hbm %s1725_s10, 32 }
0x1623   :  { %p1390_p13 = scmp.ne.s32.totalorder %s1725_s10, %s1389_s2  ;;  %p1393_p0 = scmp.lt.u32.totalorder %s1389_s2, %s1725_s10 }
0x1625   :  { %p1395_p1 = pnand %p1393_p0, %p1390_p13 }
0x1627   :  { %1398 = shalt.err (!%p1395_p1)
}
0x1628   :  { %1048 = dma.vmem_to_hbm [thread:$0]  %s1046_s28, 32, %s1725_s10, [#allocation9]  }
0x1629   :  { %s1457_s4 = smov 96   ;;  %s1399_s21 = scalar_lea.vmem %s1031_s30, 256 }
0x162a   :  { %p1400_p2 = scmp.ne.s32.totalorder %s1031_s30, %s1399_s21  ;;  %p1404_p3 = scmp.lt.s32.totalorder %s1031_s30, %s1031_s30 }
0x162b   :  { %p1405_p4 = scmp.lt.s32.totalorder %s1399_s21, %s1399_s21 }
0x162d   :  { %p1406_p5 = por %p1405_p4, %p1404_p3 }
0x162f   :  { %p1407_p6 = pnand %p1406_p5, %p1400_p2 }
0x1636   :  { %992 = vrot.lane.b32.xlu0 %v977_v35, %s1457_s4 }
0x1637   :  { %1410 = shalt.err (!%p1407_p6)
}
0x1638   :  { %s1411_s3 = scalar_lea.hbm %s1723_s8, 256 }
0x1639   :  { %p1412_p7 = scmp.ne.s32.totalorder %s1723_s8, %s1411_s3  ;;  %p1415_p8 = scmp.lt.u32.totalorder %s1411_s3, %s1723_s8 }
0x163b   :  { %p1417_p9 = pnand %p1415_p8, %p1412_p7 }
0x163d   :  { %1420 = shalt.err (!%p1417_p9)
}
0x163e   :  { %s1458_s5 = smov 128   ;;  %s1459_s25 = smov 8  }
0x163f   :  { %1036 = dma.vmem_to_hbm [thread:$0]  %s1031_s30, 256, %s1723_s8, [#allocation6], %s1458_s5, %s1458_s5, %s1459_s25  }
0x1640   :  { %s1460_s7 = smov [#allocation10]  }
0x1641   :  { %s1055_s6 = sshll.u32 %s1460_s7, 4  ;;  %s1056_s6 = int_to_ptr.vmem [resolvable:$true] %s1055_s6 }
0x1642   :  { %s1421_s12 = scalar_lea.vmem %s1056_s6, 32  ;;  %p1426_p11 = scmp.lt.s32.totalorder %s1056_s6, %s1056_s6 }
0x1643   :  { %p1422_p10 = scmp.ne.s32.totalorder %s1056_s6, %s1421_s12  ;;  %p1427_p12 = scmp.lt.s32.totalorder %s1421_s12, %s1421_s12 }
0x1645   :  { %p1428_p13 = por %p1427_p12, %p1426_p11 }
0x1647   :  { %p1429_p0 = pnand %p1428_p13, %p1422_p10 }
0x16ad   :  { %v1012_v50 = vpop.xlane.xlu0 %1011 }
0x16ae   :  { %v1021_v51 = vadd.f32 %v1094_v43, %v1012_v50 }
0x16b0   :  { %1024 = vst.msk [vmem:[%s1724_s9 + $0x8] sm:$0xff] %vm1022_vm5, %v1021_v51 }
0x16b1   :  { %v993_v52 = vpop.permute.xlu0 %992 }
0x16b2   :  { %995 = vst.msk [vmem:[#allocation10] sm:$0x3] %vm260_vm4, %v993_v52 }
0x16b3   :  { %1432 = shalt.err (!%p1429_p0)
}
0x16b4   :  { %s1433_s13 = scalar_lea.hbm %s1726_s11, 32 }
0x16b5   :  { %p1434_p1 = scmp.ne.s32.totalorder %s1726_s11, %s1433_s13  ;;  %p1437_p2 = scmp.lt.u32.totalorder %s1433_s13, %s1726_s11 }
0x16b7   :  { %p1439_p3 = pnand %p1437_p2, %p1434_p1 }
0x16b9   :  { %1442 = shalt.err (!%p1439_p3)
}
0x16ba   :  { %1058 = dma.vmem_to_hbm [thread:$0]  %s1056_s6, 32, %s1726_s11, [#allocation9]  }
0x16bb   :  { %1445 = dma.done.wait [#allocation6], 256  }
0x16bc   :  { %1446 = vsyncadd [#allocation6], 4294967040 }
0x16bd   :  { %1447 = dma.done.wait [#allocation9], 64  }
0x16be   :  { %1448 = vsyncadd [#allocation9], 4294967232 }
0x16bf   :  { %1070 = vsyncpa [#allocation5], 1 }
0x16c0   :  { %1071 = vsyncpa [#allocation6], 1 }
0x16c1   :  { %1072 = vsyncpa [#allocation9], 1 }

</bundles_post_ra>
